<compile_context>
chip_gen: v5e
topology: v5e:2x2
jax: 0.10.0
libtpu: 0.0.40
codegen_flags: <defaults>
</compile_context>

<pallas_src>
import functools

import jax
import jax.numpy as jnp
from jax.experimental import pallas as pl
from jax.experimental.pallas import tpu as pltpu


def _round_up(x, m):
    return ((x + m - 1) // m) * m


def classifier_kernel(x_ref, w1_ref, b1_ref, w2_ref, b2_ref, wc_ref, bc_ref,
                      o_ref):
    # f32 -> bf16 cast of the input tile happens in-kernel (no wrapper pass).
    x = x_ref[...].astype(w1_ref.dtype)
    # encoder layer 1: Linear (bf16 matmul, f32 accumulate) + bias + ReLU
    h = jnp.dot(x, w1_ref[...], preferred_element_type=jnp.float32)
    h = jnp.maximum(h + b1_ref[...], 0.0)
    # encoder layer 2 (to latent l_size): Linear + bias + ReLU
    z = jnp.dot(h.astype(w2_ref.dtype), w2_ref[...],
                preferred_element_type=jnp.float32)
    z = jnp.maximum(z + b2_ref[...], 0.0)
    # classifier head: Linear + bias + Sigmoid
    logits = jnp.dot(z.astype(wc_ref.dtype), wc_ref[...],
                     preferred_element_type=jnp.float32) + bc_ref[...]
    # sigmoid(x) == 0.5 * tanh(0.5 * x) + 0.5  -> one EUP op + cheap VPU fma
    o_ref[...] = (0.5 * jnp.tanh(0.5 * logits) + 0.5).astype(o_ref.dtype)


def prepare_params(w1, b1, w2, b2, wc, bc, compute_dtype=jnp.bfloat16):
    """One-time parameter prep (do at load time, NOT per forward call).

    Weights go to bf16 for MXU-peak matmuls; biases stay f32 because they are
    added to the f32 accumulators on the VPU.  No padding is needed: all
    weight/bias blocks cover the full array, which Pallas allows regardless of
    (8, 128) divisibility.
    """
    return (w1.astype(compute_dtype), b1.reshape(1, -1).astype(jnp.float32),
            w2.astype(compute_dtype), b2.reshape(1, -1).astype(jnp.float32),
            wc.astype(compute_dtype), bc.reshape(1, -1).astype(jnp.float32))


@functools.partial(jax.jit, static_argnames=("max_batch_tile",))
def classifier_forward(x, w1, b1, w2, b2, wc, bc, *, max_batch_tile=1024):
    B, in_dim = x.shape
    hidden = w1.shape[1]
    l_size = w2.shape[1]
    num_classes = wc.shape[1]

    # ---- batch tiling: no padding, partial edge blocks handle the remainder.
    if B <= max_batch_tile:
        batch_tile = B                    # block dim == full dim: always legal
        steps = 1
    else:
        batch_tile = max_batch_tile       # multiple of 8 (sublane aligned)
        steps = pl.cdiv(B, batch_tile)
        if steps % 2:                     # v7x megacore: keep step count even
            steps += 1
            batch_tile = _round_up(pl.cdiv(B, steps), 8)
            steps = pl.cdiv(B, batch_tile)
    grid = (steps,)

    # ---- VMEM budget from actual buffer sizes (+ headroom), not hard-coded.
    io_tiles = 2 * batch_tile * (in_dim + num_classes) * 4      # dbl-buffered
    weights = 2 * (in_dim * hidden + hidden * l_size + l_size * num_classes) * 2
    biases = 2 * (hidden + l_size + num_classes) * 4
    inter = batch_tile * (hidden + l_size + num_classes) * 4    # h, z, logits
    vmem_limit = min(int(io_tiles + weights + biases + 2 * inter) + (8 << 20),
                     64 << 20)

    # Parameters are broadcast to every batch tile (index_map -> block (0, 0)).
    full = lambda shape: pl.BlockSpec(shape, lambda i: (0, 0))

    # TODO(synk): if a real encoder with tens of MiB of weights is plugged in,
    # add a K-tiling grid axis ("arbitrary") with an f32 VMEM accumulator
    # instead of keeping all weight matrices fully resident (v7x has only
    # 64 MiB of physical VMEM).
    out = pl.pallas_call(
        classifier_kernel,
        out_shape=jax.ShapeDtypeStruct((B, num_classes), jnp.float32),
        grid_spec=pltpu.PrefetchScalarGridSpec(
            num_scalar_prefetch=0,
            grid=grid,
            in_specs=[
                pl.BlockSpec((batch_tile, in_dim), lambda i: (i, 0)),  # x tile
                full((in_dim, hidden)),       # W1
                full((1, hidden)),            # b1
                full((hidden, l_size)),       # W2
                full((1, l_size)),            # b2
                full((l_size, num_classes)),  # Wc
                full((1, num_classes)),       # bc
            ],
            out_specs=pl.BlockSpec((batch_tile, num_classes),
                                   lambda i: (i, 0)),
        ),
        compiler_params=pltpu.CompilerParams(
            dimension_semantics=("parallel",),
            vmem_limit_bytes=vmem_limit,
        ),
    )(x, w1, b1, w2, b2, wc, bc)

    return out


def init_params(key, in_dim, hidden, l_size, num_classes, dtype=jnp.float32):
    ks = jax.random.split(key, 6)
    scale = 0.1
    w1 = scale * jax.random.normal(ks[0], (in_dim, hidden), dtype)
    b1 = scale * jax.random.normal(ks[1], (1, hidden), dtype)
    w2 = scale * jax.random.normal(ks[2], (hidden, l_size), dtype)
    b2 = scale * jax.random.normal(ks[3], (1, l_size), dtype)
    wc = scale * jax.random.normal(ks[4], (l_size, num_classes), dtype)
    bc = scale * jax.random.normal(ks[5], (1, num_classes), dtype)
    return w1, b1, w2, b2, wc, bc


def reference_forward(x, w1, b1, w2, b2, wc, bc):
    h = jnp.maximum(x @ w1 + b1, 0.0)
    z = jnp.maximum(h @ w2 + b2, 0.0)
    return jax.nn.sigmoid(z @ wc + bc)


if __name__ == "__main__":
    # small shapes: batch=8, in_dim=32, hidden=32, l_size=16, num_classes=4
    B, in_dim, hidden, l_size, num_classes = 8, 32, 32, 16, 4

    key = jax.random.PRNGKey(0)
    kx, kp = jax.random.split(key)
    x = jax.random.normal(kx, (B, in_dim), jnp.float32)
    raw_params = init_params(kp, in_dim, hidden, l_size, num_classes)
    params = prepare_params(*raw_params)   # one-time cast, outside forward

    out = jax.block_until_ready(classifier_forward(x, *params))
    ref = reference_forward(x, *raw_params)
    assert out.shape == (B, num_classes)
    # bf16 matmuls -> compare with a modest tolerance vs the f32 reference
    assert jnp.allclose(out, ref, atol=2e-2, rtol=0), "mismatch vs reference"

    # second check: non-multiple-of-8 batch, forced multi-step grid with a
    # partial edge block (exercises the tiled / edge-masked path cheaply)
    B2 = 300
    x2 = jax.random.normal(jax.random.PRNGKey(1), (B2, in_dim), jnp.float32)
    out2 = jax.block_until_ready(
        classifier_forward(x2, *params, max_batch_tile=128))
    ref2 = reference_forward(x2, *raw_params)
    assert out2.shape == (B2, num_classes)
    assert jnp.allclose(out2, ref2, atol=2e-2, rtol=0), "mismatch (tiled batch)"
    assert jnp.all(jnp.isfinite(out2)), "non-finite values in tiled output"

    # TODO(synk): encoder dropout omitted (identity at inference); the exact
    # encoder architecture of the original autoencoder is not specified.
    print("KERNEL_OK")
</pallas_src>

<mosaic_0001>
module attributes {stable_mosaic.version = 11 : i64} {
  func.func @classifier_kernel(%arg0: i32, %arg1: memref<8x32xf32, #tpu.memory_space<vmem>>, %arg2: memref<32x32xbf16, #tpu.memory_space<vmem>>, %arg3: memref<1x32xf32, #tpu.memory_space<vmem>>, %arg4: memref<32x16xbf16, #tpu.memory_space<vmem>>, %arg5: memref<1x16xf32, #tpu.memory_space<vmem>>, %arg6: memref<16x4xbf16, #tpu.memory_space<vmem>>, %arg7: memref<1x4xf32, #tpu.memory_space<vmem>>, %arg8: memref<8x4xf32, #tpu.memory_space<vmem>>) attributes {dimension_semantics = [#tpu.dimension_semantics<parallel>], iteration_bounds = array<i64: 1>, scalar_prefetch = 0 : i64, scratch_operands = 0 : i64, tpu.core_type = #tpu.core_type<tc>, window_params = [{transform_indices = @transform_0, window_bounds = array<i64: 8, 32>}, {pipeline_mode = #tpu.pipeline_mode<synchronous>, transform_indices = @transform_1, window_bounds = array<i64: 32, 32>}, {pipeline_mode = #tpu.pipeline_mode<synchronous>, transform_indices = @transform_2, window_bounds = array<i64: 1, 32>}, {pipeline_mode = #tpu.pipeline_mode<synchronous>, transform_indices = @transform_3, window_bounds = array<i64: 32, 16>}, {pipeline_mode = #tpu.pipeline_mode<synchronous>, transform_indices = @transform_4, window_bounds = array<i64: 1, 16>}, {pipeline_mode = #tpu.pipeline_mode<synchronous>, transform_indices = @transform_5, window_bounds = array<i64: 16, 4>}, {pipeline_mode = #tpu.pipeline_mode<synchronous>, transform_indices = @transform_6, window_bounds = array<i64: 1, 4>}, {transform_indices = @transform_7, window_bounds = array<i64: 8, 4>}]} {
    %c0 = arith.constant 0 : index
    %c0_0 = arith.constant 0 : index
    %0 = vector.load %arg1[%c0, %c0_0] : memref<8x32xf32, #tpu.memory_space<vmem>>, vector<8x32xf32>
    %1 = arith.truncf %0 : vector<8x32xf32> to vector<8x32xbf16>
    %c0_1 = arith.constant 0 : index
    %c0_2 = arith.constant 0 : index
    %2 = vector.load %arg2[%c0_1, %c0_2] : memref<32x32xbf16, #tpu.memory_space<vmem>>, vector<32x32xbf16>
    %cst = arith.constant dense<0.000000e+00> : vector<8x32xf32>
    %3 = tpu.matmul %1, %2, %cst {dimension_numbers = #tpu.dot_dimension_numbers<[1], [0], [0], [1], [0, 0, 1, 1], [], []>} : vector<8x32xbf16>, vector<32x32xbf16>, vector<8x32xf32> -> vector<8x32xf32>
    %c0_3 = arith.constant 0 : index
    %c0_4 = arith.constant 0 : index
    %4 = vector.load %arg3[%c0_3, %c0_4] : memref<1x32xf32, #tpu.memory_space<vmem>>, vector<1x32xf32>
    %5 = vector.broadcast %4 : vector<1x32xf32> to vector<8x32xf32>
    %6 = arith.addf %3, %5 : vector<8x32xf32>
    %cst_5 = arith.constant 0.000000e+00 : f32
    %7 = vector.broadcast %cst_5 : f32 to vector<8x32xf32>
    %8 = arith.maximumf %6, %7 : vector<8x32xf32>
    %9 = arith.truncf %8 : vector<8x32xf32> to vector<8x32xbf16>
    %c0_6 = arith.constant 0 : index
    %c0_7 = arith.constant 0 : index
    %10 = vector.load %arg4[%c0_6, %c0_7] : memref<32x16xbf16, #tpu.memory_space<vmem>>, vector<32x16xbf16>
    %cst_8 = arith.constant dense<0.000000e+00> : vector<8x16xf32>
    %11 = tpu.matmul %9, %10, %cst_8 {dimension_numbers = #tpu.dot_dimension_numbers<[1], [0], [0], [1], [0, 0, 1, 1], [], []>} : vector<8x32xbf16>, vector<32x16xbf16>, vector<8x16xf32> -> vector<8x16xf32>
    %c0_9 = arith.constant 0 : index
    %c0_10 = arith.constant 0 : index
    %12 = vector.load %arg5[%c0_9, %c0_10] : memref<1x16xf32, #tpu.memory_space<vmem>>, vector<1x16xf32>
    %13 = vector.broadcast %12 : vector<1x16xf32> to vector<8x16xf32>
    %14 = arith.addf %11, %13 : vector<8x16xf32>
    %cst_11 = arith.constant 0.000000e+00 : f32
    %15 = vector.broadcast %cst_11 : f32 to vector<8x16xf32>
    %16 = arith.maximumf %14, %15 : vector<8x16xf32>
    %17 = arith.truncf %16 : vector<8x16xf32> to vector<8x16xbf16>
    %c0_12 = arith.constant 0 : index
    %c0_13 = arith.constant 0 : index
    %18 = vector.load %arg6[%c0_12, %c0_13] : memref<16x4xbf16, #tpu.memory_space<vmem>>, vector<16x4xbf16>
    %cst_14 = arith.constant dense<0.000000e+00> : vector<8x4xf32>
    %19 = tpu.matmul %17, %18, %cst_14 {dimension_numbers = #tpu.dot_dimension_numbers<[1], [0], [0], [1], [0, 0, 1, 1], [], []>} : vector<8x16xbf16>, vector<16x4xbf16>, vector<8x4xf32> -> vector<8x4xf32>
    %c0_15 = arith.constant 0 : index
    %c0_16 = arith.constant 0 : index
    %20 = vector.load %arg7[%c0_15, %c0_16] : memref<1x4xf32, #tpu.memory_space<vmem>>, vector<1x4xf32>
    %21 = vector.broadcast %20 : vector<1x4xf32> to vector<8x4xf32>
    %22 = arith.addf %19, %21 : vector<8x4xf32>
    %cst_17 = arith.constant 5.000000e-01 : f32
    %23 = vector.broadcast %cst_17 : f32 to vector<8x4xf32>
    %24 = arith.mulf %23, %22 : vector<8x4xf32>
    %25 = math.tanh %24 : vector<8x4xf32>
    %cst_18 = arith.constant 5.000000e-01 : f32
    %26 = vector.broadcast %cst_18 : f32 to vector<8x4xf32>
    %27 = arith.mulf %26, %25 : vector<8x4xf32>
    %cst_19 = arith.constant 5.000000e-01 : f32
    %28 = vector.broadcast %cst_19 : f32 to vector<8x4xf32>
    %29 = arith.addf %27, %28 : vector<8x4xf32>
    %c0_20 = arith.constant 0 : index
    %c0_21 = arith.constant 0 : index
    %30 = vector.load %arg8[%c0_20, %c0_21] : memref<8x4xf32, #tpu.memory_space<vmem>>, vector<8x4xf32>
    tpu.vector_store %arg8[%c0_20, %c0_21], %29 {strides = array<i32>} : memref<8x4xf32, #tpu.memory_space<vmem>>, vector<8x4xf32>,
    return
  }
  func.func @transform_0(%arg0: i32) -> (i32, i32) {
    %c0_i32 = arith.constant 0 : i32
    %c0_i32_0 = arith.constant 0 : i32
    return %arg0, %c0_i32 : i32, i32
  }
  func.func @transform_1(%arg0: i32) -> (i32, i32) {
    %c0_i32 = arith.constant 0 : i32
    %c0_i32_0 = arith.constant 0 : i32
    %c0_i32_1 = arith.constant 0 : i32
    return %c0_i32, %c0_i32_0 : i32, i32
  }
  func.func @transform_2(%arg0: i32) -> (i32, i32) {
    %c0_i32 = arith.constant 0 : i32
    %c0_i32_0 = arith.constant 0 : i32
    %c0_i32_1 = arith.constant 0 : i32
    return %c0_i32, %c0_i32_0 : i32, i32
  }
  func.func @transform_3(%arg0: i32) -> (i32, i32) {
    %c0_i32 = arith.constant 0 : i32
    %c0_i32_0 = arith.constant 0 : i32
    %c0_i32_1 = arith.constant 0 : i32
    return %c0_i32, %c0_i32_0 : i32, i32
  }
  func.func @transform_4(%arg0: i32) -> (i32, i32) {
    %c0_i32 = arith.constant 0 : i32
    %c0_i32_0 = arith.constant 0 : i32
    %c0_i32_1 = arith.constant 0 : i32
    return %c0_i32, %c0_i32_0 : i32, i32
  }
  func.func @transform_5(%arg0: i32) -> (i32, i32) {
    %c0_i32 = arith.constant 0 : i32
    %c0_i32_0 = arith.constant 0 : i32
    %c0_i32_1 = arith.constant 0 : i32
    return %c0_i32, %c0_i32_0 : i32, i32
  }
  func.func @transform_6(%arg0: i32) -> (i32, i32) {
    %c0_i32 = arith.constant 0 : i32
    %c0_i32_0 = arith.constant 0 : i32
    %c0_i32_1 = arith.constant 0 : i32
    return %c0_i32, %c0_i32_0 : i32, i32
  }
  func.func @transform_7(%arg0: i32) -> (i32, i32) {
    %c0_i32 = arith.constant 0 : i32
    %c0_i32_0 = arith.constant 0 : i32
    return %arg0, %c0_i32 : i32, i32
  }
}

</mosaic_0001>

<bundles_post_ra>
// kernel: classifier_forward.1
= control target key start
LH: loop header
LB: loop body
LE: loop exit
PB: predicated region body
PF: predicated region fallthrough
CT: control target
= control target key end

     0   :  { %vm49_vm0 = vcmask 261120   ;;  %vm118_vm1 = vcmask 130048   ;;  %vm139_vm2 = vcmask 31744   ;;  %s248_s1 = inlined_call_operand.vmem [shape: bf16[32,32], index: 1, kind: input, shape index: {}]   ;;  %s249_s0 = inlined_call_operand.vmem [shape: f32[8,32], index: 0, kind: input, shape index: {}]   ;;  %s250_s2 = inlined_call_operand.vmem [shape: f32[1,32], index: 2, kind: input, shape index: {}]   ;;  %s251_s4 = inlined_call_operand.vmem [shape: f32[1,16], index: 4, kind: input, shape index: {}]   ;;  %s252_s3 = inlined_call_operand.vmem [shape: bf16[32,16], index: 3, kind: input, shape index: {}]   ;;  %s253_s6 = inlined_call_operand.vmem [shape: f32[1,4], index: 6, kind: input, shape index: {}]   ;;  %s254_s5 = inlined_call_operand.vmem [shape: bf16[16,4], index: 5, kind: input, shape index: {}]   ;;  %s255_s7 = inlined_call_operand.vmem [shape: f32[8,4], index: 7, kind: output, shape index: {}]  }
   0x1   :  { %v169_v0 = vld [vmem:[%s248_s1 + $0x8] sm:$0xff]  ;;  %v168_v1 = vld [vmem:[%s248_s1] sm:$0xff] }
   0x2   :  { %59 = vmatpush.bf16.msra.mxu0 %v169_v0  ;;  %v27_v2 = vld [vmem:[%s249_s0] sm:$0xff]  ;;  %v171_v4 = vld [vmem:[%s252_s3 + $0x8] sm:$0xff] }
   0x3   :  { %v28_v3 = vpack.c.bf16 %v27_v2, %v27_v2  ;;  %97 = vmatpush.bf16.msra.mxu1 %v171_v4  ;;  %v170_v5 = vld [vmem:[%s252_s3] sm:$0xff] }
   0x4   :  { %v173_v6 = vld [vmem:[%s250_s2] ss:$0 sm:$0xff] }
   0x5   :  { %v172_v12 = vld [vmem:[%s254_s5] sm:$0xff] }
   0x6   :  { %60 = vmatpush.bf16.msra.mxu0 %v168_v1  ;;  %129 = vmatpush.bf16.msra.mxu2 %v172_v12  ;;  %v174_v13 = vld [vmem:[%s251_s4] ss:$0 sm:$0xff] }
   0x7   :  { %98 = vmatpush.bf16.msra.mxu1 %v170_v5  ;;  %v175_v19 = vld [vmem:[%s253_s6] ss:$0 sm:$0xff] }
   0x9   :  { %153 = vmatmul.msk.bf16.vlgmr.msra.gmra.mxu0 %vm49_vm0, %v28_v3 }
  0x86   :  { %v62_v7 = vpop.f32.mrf.mxu0 }
  0x87   :  { %v63_v8 = vadd.f32 %v173_v6, %v62_v7 }
  0x89   :  { %v66_v9 = vmax.f32 %v63_v8, 0.0 }
  0x8b   :  { %v67_v10 = vpack.c.bf16 %v66_v9, %v66_v9 }
  0x8d   :  { %162 = vmatmul.msk.bf16.vlgmr.msra.gmra.mxu1 %vm49_vm0, %v67_v10 }
  0x8e   :  { %v64_v11 = vpop.f32.mrf.mxu0 }
 0x10a   :  { %v100_v14 = vpop.f32.mrf.mxu1 }
 0x10b   :  { %v101_v15 = vadd.f32 %v174_v13, %v100_v14 }
 0x10d   :  { %v104_v16 = vmax.f32 %v101_v15, 0.0 }
 0x10f   :  { %v105_v17 = vpack.c.bf16 %v104_v16, %v104_v16 }
 0x111   :  { %167 = vmatmul.msk.bf16.vlgmr.msra.gmra.mxu2 %vm118_vm1, %v105_v17 }
 0x112   :  { %v102_v18 = vpop.f32.mrf.mxu1 }
 0x194   :  { %v131_v20 = vpop.f32.mrf.mxu2 }
 0x195   :  { %v132_v21 = vadd.f32 %v175_v19, %v131_v20 }
 0x197   :  { %v135_v22 = vmul.f32 0.5, %v132_v21 }
 0x199   :  { %176 = vtanh.f32 %v135_v22 }
 0x19c   :  { %v133_v23 = vpop.f32.mrf.mxu2 }
 0x19f   :  { %v177_v24 = vpop.eup %176 }
 0x1a0   :  { %v137_v25 = vmul.f32 0.5, %v177_v24 }
 0x1a2   :  { %v138_v26 = vadd.f32 0.5, %v137_v25 }
 0x1a4   :  { %140 = vst.msk [vmem:[%s255_s7] sm:$0xff] %vm139_vm2, %v138_v26 }

</bundles_post_ra>
